<compile_context>
chip_gen: v6e
topology: v6e:2x2x1
jax: 0.10.0
libtpu: 0.0.40
codegen_flags: <defaults>
</compile_context>

<pallas_src>
import functools

import jax
import jax.numpy as jnp
from jax.experimental import pallas as pl
from jax.experimental.pallas import tpu as pltpu

EPS = 1e-5
LANE = 128
SUBLANE = 8

# Lazily probed: does this jax/Mosaic build accept pipeline_mode=pl.Buffered(1)?
_SINGLE_BUFFER_OK = None


def _round_up(x, m):
    return ((x + m - 1) // m) * m


# ---------------------------------------------------------------------------
# Kernels
# ---------------------------------------------------------------------------

def _stats_kernel(x_ref, w_ref, b_ref, gamma_ref, beta_ref, stats_ref, *,
                  n_rows, tile_n, ragged):
    """Phase 1: accumulate per-feature sum / sum-of-squares of h = ReLU(x@W+b).

    stats_ref is a (2, F) f32 output kept VMEM-resident across the row grid
    (same block index every step).  On the final step it is overwritten with
    (scale, shift) so phase 2 is a single multiply-add per element.
    """
    i = pl.program_id(0)
    last = pl.num_programs(0) - 1

    @pl.when(i == 0)
    def _init():
        stats_ref[...] = jnp.zeros_like(stats_ref)

    x = x_ref[...]
    if x.dtype != w_ref.dtype:          # in-kernel cast (free VPU work, no extra HBM pass)
        x = x.astype(w_ref.dtype)
    h = jnp.dot(x, w_ref[...], preferred_element_type=jnp.float32)
    h = jnp.maximum(h + b_ref[...], 0.0)
    # TODO(synk): Dropout(p>0) would go here; p=0.0 in this module -> identity.

    if ragged:
        # Only the boundary tile pays for the row mask (garbage rows beyond n_rows
        # must not pollute the batch statistics).
        @pl.when(i == last)
        def _acc_masked():
            row = i * tile_n + jax.lax.broadcasted_iota(jnp.int32, (tile_n, 1), 0)
            hm = jnp.where(row < n_rows, h, 0.0)
            stats_ref[0:1, :] += jnp.sum(hm, axis=0, keepdims=True)
            stats_ref[1:2, :] += jnp.sum(hm * hm, axis=0, keepdims=True)

        @pl.when(i != last)
        def _acc_full():
            stats_ref[0:1, :] += jnp.sum(h, axis=0, keepdims=True)
            stats_ref[1:2, :] += jnp.sum(h * h, axis=0, keepdims=True)
    else:
        stats_ref[0:1, :] += jnp.sum(h, axis=0, keepdims=True)
        stats_ref[1:2, :] += jnp.sum(h * h, axis=0, keepdims=True)

    @pl.when(i == last)
    def _finalize():
        inv_n = jnp.float32(1.0 / n_rows)
        mean = stats_ref[0:1, :] * inv_n
        ex2 = stats_ref[1:2, :] * inv_n
        var = jnp.maximum(ex2 - mean * mean, 0.0)            # biased variance
        scale = jax.lax.rsqrt(var + EPS) * gamma_ref[...]
        shift = beta_ref[...] - mean * scale
        stats_ref[0:1, :] = scale
        stats_ref[1:2, :] = shift


def _normalize_kernel(x_ref, w_ref, b_ref, stats_ref, o_ref):
    """Phase 2: recompute h for this row tile and apply y = h*scale + shift."""
    x = x_ref[...]
    if x.dtype != w_ref.dtype:
        x = x.astype(w_ref.dtype)
    h = jnp.dot(x, w_ref[...], preferred_element_type=jnp.float32)
    h = jnp.maximum(h + b_ref[...], 0.0)
    y = h * stats_ref[0:1, :] + stats_ref[1:2, :]
    o_ref[...] = y.astype(o_ref.dtype)


# ---------------------------------------------------------------------------
# Sizing helpers (generation-aware)
# ---------------------------------------------------------------------------

def _vmem_budget_bytes():
    """Usable VMEM budget for this kernel: ~48 MiB on 64-MiB parts (v7x),
    ~96 MiB on 128-MiB parts (v5e/v6e).  Conservative default if the query fails."""
    phys = 64 * 1024 * 1024
    try:
        info = pltpu.get_tpu_info()
        phys = int(getattr(info, "vmem_capacity_bytes", phys))
    except Exception:
        pass
    return max(min(phys * 3 // 4, phys - (16 << 20)), 16 << 20)


def _auto_block_rows(fin, fout_eff, in_isz, out_isz, w_isz, vmem_budget):
    """Largest row tile that fits the VMEM budget, clamped to [1024, 8192]."""
    per_row = (2 * fin * in_isz            # x tile (double-buffered)
               + 2 * fout_eff * out_isz    # y tile (double-buffered)
               + 2 * fout_eff * 4)         # f32 intermediates / headroom
    fixed = (2 * fin * fout_eff * w_isz    # weights (worst case double-buffered)
             + 32 * fout_eff * 4 + (2 << 20))
    rows = (vmem_budget - fixed) // max(per_row, 1)
    rows = max(min(rows, 8192), 1024)
    return int(max(rows // SUBLANE, 1) * SUBLANE)


def _const_spec(shape, single_buffer):
    """BlockSpec for a constant-index operand; single-buffered when supported."""
    idx = lambda i: (0, 0)
    if single_buffer and hasattr(pl, "Buffered"):
        try:
            return pl.BlockSpec(shape, idx, pipeline_mode=pl.Buffered(1))
        except TypeError:
            pass
    return pl.BlockSpec(shape, idx)


# ---------------------------------------------------------------------------
# Wrappers
# ---------------------------------------------------------------------------

def prepare_linear_bn_params(w, b, gamma, beta, *, matmul_dtype=None,
                             pad_features=False):
    """One-time parameter prep (hoisted out of the per-call path).

    w: (Fout, Fin) torch Linear layout.  Returns W transposed to (Fin, F_eff)
    (F_eff = Fout, or Fout padded to a multiple of 128 if pad_features), plus
    (1, F_eff) f32 bias / gamma / beta and the true Fout.
    """
    fout, fin = w.shape
    fout_eff = _round_up(fout, LANE) if pad_features else fout
    pad_f = fout_eff - fout

    w_t = jnp.transpose(w)                       # (Fin, Fout) — done once
    if matmul_dtype is not None:
        w_t = w_t.astype(matmul_dtype)
    if pad_f:
        w_t = jnp.pad(w_t, ((0, 0), (0, pad_f)))

    def _vec(v):
        v = v.astype(jnp.float32).reshape(1, fout)
        return jnp.pad(v, ((0, 0), (0, pad_f))) if pad_f else v

    return w_t, _vec(b), _vec(gamma), _vec(beta), fout


def linear_batch_norm_apply(x, params, *, block_rows=None, out_dtype=None):
    """Apply Linear -> ReLU -> (Dropout p=0) -> BatchNorm1d using prepared params."""
    global _SINGLE_BUFFER_OK
    w_t, b2, g2, be2, _fout = params

    has_tile_dim = x.ndim > 2
    if has_tile_dim:
        bs, nbt = x.shape[0], x.shape[1]
        x2d = x.reshape(bs * nbt, x.shape[-1])
    else:
        x2d = x

    out_dtype = x.dtype if out_dtype is None else jnp.dtype(out_dtype)
    n, fin = x2d.shape
    fin_w, fout_eff = w_t.shape
    assert fin == fin_w, (fin, fin_w)

    in_isz = jnp.dtype(x2d.dtype).itemsize
    w_isz = jnp.dtype(w_t.dtype).itemsize
    out_isz = jnp.dtype(out_dtype).itemsize

    vmem_budget = _vmem_budget_bytes()
    if block_rows is None:
        block_rows = _auto_block_rows(fin, fout_eff, in_isz, out_isz, w_isz,
                                      vmem_budget)
    assert block_rows % SUBLANE == 0, "block_rows must be a multiple of 8"

    # Row tiling: no padding of x.  grid = cdiv(n, tile); the ragged last tile is
    # masked in-kernel (stats) and its out-of-bounds output rows are dropped.
    tile_n = min(block_rows, _round_up(n, SUBLANE))
    grid = (pl.cdiv(n, tile_n),)
    ragged = (n % tile_n) != 0

    footprint = (2 * tile_n * fin * in_isz
                 + 2 * fin * fout_eff * w_isz
                 + 2 * tile_n * fout_eff * out_isz
                 + 2 * tile_n * fout_eff * 4
                 + 32 * fout_eff * 4 + (2 << 20))
    vmem_limit = int(min(max(footprint, 16 << 20), vmem_budget))

    x_spec = pl.BlockSpec((tile_n, fin), lambda i: (i, 0))
    y_spec = pl.BlockSpec((tile_n, fout_eff), lambda i: (i, 0))
    stats_out_spec = pl.BlockSpec((2, fout_eff), lambda i: (0, 0))

    matmul_flops = 2 * n * fin * fout_eff
    xw_bytes = n * fin * in_isz + fin * fout_eff * w_isz

    stats_kernel = functools.partial(_stats_kernel, n_rows=n, tile_n=tile_n,
                                     ragged=ragged)

    def _run(single_buffer):
        w_spec = _const_spec((fin, fout_eff), single_buffer)
        vec_spec = _const_spec((1, fout_eff), single_buffer)
        stats_in_spec = _const_spec((2, fout_eff), single_buffer)

        # Phase 1: global batch statistics (row axis is a reduction -> 'arbitrary').
        stats = pl.pallas_call(
            stats_kernel,
            out_shape=jax.ShapeDtypeStruct((2, fout_eff), jnp.float32),
            grid=grid,
            in_specs=[x_spec, w_spec, vec_spec, vec_spec, vec_spec],
            out_specs=stats_out_spec,
            compiler_params=pltpu.CompilerParams(
                dimension_semantics=("arbitrary",),
                vmem_limit_bytes=vmem_limit),
            cost_estimate=pl.CostEstimate(
                flops=matmul_flops + 4 * n * fout_eff,
                transcendentals=fout_eff,
                bytes_accessed=xw_bytes + 8 * fout_eff * 4),
        )(x2d, w_t, b2, g2, be2)

        # Phase 2: normalize (rows independent -> 'parallel', megacore-friendly).
        return pl.pallas_call(
            _normalize_kernel,
            out_shape=jax.ShapeDtypeStruct((n, fout_eff), out_dtype),
            grid=grid,
            in_specs=[x_spec, w_spec, vec_spec, stats_in_spec],
            out_specs=y_spec,
            compiler_params=pltpu.CompilerParams(
                dimension_semantics=("parallel",),
                vmem_limit_bytes=vmem_limit),
            cost_estimate=pl.CostEstimate(
                flops=matmul_flops + 3 * n * fout_eff,
                transcendentals=0,
                bytes_accessed=xw_bytes + n * fout_eff * out_isz),
        )(x2d, w_t, b2, stats)

    if _SINGLE_BUFFER_OK is None:
        try:
            y2d = _run(True)
            _SINGLE_BUFFER_OK = True
        except Exception:
            _SINGLE_BUFFER_OK = False
            y2d = _run(False)
    else:
        y2d = _run(_SINGLE_BUFFER_OK)

    if has_tile_dim:
        y2d = y2d.reshape(bs, nbt, fout_eff)
    return y2d


def linear_batch_norm(x, w, b, gamma, beta, *, block_rows=None, matmul_dtype=None,
                      out_dtype=None, pad_features=False):
    """Convenience wrapper: prepare params (transpose/cast once) and apply."""
    params = prepare_linear_bn_params(w, b, gamma, beta, matmul_dtype=matmul_dtype,
                                      pad_features=pad_features)
    return linear_batch_norm_apply(x, params, block_rows=block_rows,
                                   out_dtype=out_dtype)


# ---------------------------------------------------------------------------
# Reference & test
# ---------------------------------------------------------------------------

def _reference(x, w, b, gamma, beta):
    has_tile_dim = x.ndim > 2
    if has_tile_dim:
        bs, nbt, _ = x.shape
        x = x.reshape(bs * nbt, -1)
    h = jnp.maximum(x @ w.T + b, 0.0)
    mean = jnp.mean(h, axis=0, keepdims=True)
    var = jnp.mean((h - mean) ** 2, axis=0, keepdims=True)
    y = (h - mean) / jnp.sqrt(var + EPS) * gamma + beta
    if has_tile_dim:
        y = y.reshape(bs, nbt, -1)
    return y


if __name__ == "__main__":
    key = jax.random.PRNGKey(0)

    def make_case(k, bs, nbt, fin, fout):
        kx, kw, kb = jax.random.split(k, 3)
        bound = 1.0 / (fin ** 0.5)
        x = jax.random.normal(kx, (bs, nbt, fin), dtype=jnp.float32)
        w = jax.random.uniform(kw, (fout, fin), jnp.float32, -bound, bound)
        b = jax.random.uniform(kb, (fout,), jnp.float32, -bound, bound)
        gamma = jnp.ones((fout,), jnp.float32)   # BatchNorm1d weight
        beta = jnp.zeros((fout,), jnp.float32)   # BatchNorm1d bias
        return x, w, b, gamma, beta

    k1, k2 = jax.random.split(key)

    # Case 1: module-sized shapes, f32 matmul, single row tile (auto tile size).
    x, w, b, gamma, beta = make_case(k1, 2, 8, 32, 32)
    y = jax.block_until_ready(linear_batch_norm(x, w, b, gamma, beta))
    y_ref = _reference(x, w, b, gamma, beta)
    assert y.shape == (2, 8, 32)
    assert jnp.allclose(y, y_ref, atol=2e-5, rtol=2e-5), "case1 mismatch vs reference"

    # Case 2: non-divisible rows/features + multi-tile grid (exercises the ragged
    # boundary tile masking and cross-tile stat accumulation, no x padding).
    x2, w2, b2, gamma2, beta2 = make_case(k2, 3, 37, 48, 72)
    y2 = jax.block_until_ready(
        linear_batch_norm(x2, w2, b2, gamma2, beta2, block_rows=64))
    y2_ref = _reference(x2, w2, b2, gamma2, beta2)
    assert y2.shape == (3, 37, 72)
    assert jnp.allclose(y2, y2_ref, atol=1e-4, rtol=1e-4), "case2 mismatch vs reference"

    # Case 3: bf16 matmul operands (f32 accumulation / f32 BN math) — loose tolerance.
    y3 = jax.block_until_ready(
        linear_batch_norm(x2, w2, b2, gamma2, beta2, block_rows=64,
                          matmul_dtype=jnp.bfloat16))
    assert y3.shape == (3, 37, 72)
    assert jnp.allclose(y3, y2_ref, atol=1e-1, rtol=1e-1), "bf16 case mismatch"

    print("KERNEL_OK")
</pallas_src>

<mosaic_0001>
module attributes {stable_mosaic.version = 11 : i64} {
  func.func @_stats_kernel(%arg0: i32, %arg1: memref<16x32xf32, #tpu.memory_space<vmem>>, %arg2: memref<32x32xf32, #tpu.memory_space<vmem>>, %arg3: memref<1x32xf32, #tpu.memory_space<vmem>>, %arg4: memref<1x32xf32, #tpu.memory_space<vmem>>, %arg5: memref<1x32xf32, #tpu.memory_space<vmem>>, %arg6: memref<2x32xf32, #tpu.memory_space<vmem>>) attributes {dimension_semantics = [#tpu.dimension_semantics<arbitrary>], iteration_bounds = array<i64: 1>, scalar_prefetch = 0 : i64, scratch_operands = 0 : i64, tpu.core_type = #tpu.core_type<tc>, window_params = [{transform_indices = @transform_0, window_bounds = array<i64: 16, 32>}, {pipeline_mode = #tpu.pipeline_mode<synchronous>, transform_indices = @transform_1, window_bounds = array<i64: 32, 32>}, {pipeline_mode = #tpu.pipeline_mode<synchronous>, transform_indices = @transform_2, window_bounds = array<i64: 1, 32>}, {pipeline_mode = #tpu.pipeline_mode<synchronous>, transform_indices = @transform_3, window_bounds = array<i64: 1, 32>}, {pipeline_mode = #tpu.pipeline_mode<synchronous>, transform_indices = @transform_4, window_bounds = array<i64: 1, 32>}, {pipeline_mode = #tpu.pipeline_mode<synchronous>, transform_indices = @transform_5, window_bounds = array<i64: 2, 32>}]} {
    %c0_i32 = arith.constant 0 : i32
    %0 = arith.cmpi eq, %arg0, %c0_i32 : i32
    %1 = arith.extui %0 : i1 to i32
    %c0_i32_0 = arith.constant 0 : i32
    %2 = arith.cmpi ne, %1, %c0_i32_0 : i32
    scf.if %2 {
      %cst_18 = arith.constant 0.000000e+00 : f32
      %25 = vector.broadcast %cst_18 : f32 to vector<2x32xf32>
      %c0_19 = arith.constant 0 : index
      %c0_20 = arith.constant 0 : index
      %26 = vector.load %arg6[%c0_19, %c0_20] : memref<2x32xf32, #tpu.memory_space<vmem>>, vector<2x32xf32>
      tpu.vector_store %arg6[%c0_19, %c0_20], %25 {strides = array<i32>} : memref<2x32xf32, #tpu.memory_space<vmem>>, vector<2x32xf32>,
    } else {
    }
    %c0 = arith.constant 0 : index
    %c0_1 = arith.constant 0 : index
    %3 = vector.load %arg1[%c0, %c0_1] : memref<16x32xf32, #tpu.memory_space<vmem>>, vector<16x32xf32>
    %c0_2 = arith.constant 0 : index
    %c0_3 = arith.constant 0 : index
    %4 = vector.load %arg2[%c0_2, %c0_3] : memref<32x32xf32, #tpu.memory_space<vmem>>, vector<32x32xf32>
    %cst = arith.constant dense<0.000000e+00> : vector<16x32xf32>
    %5 = tpu.matmul %3, %4, %cst {dimension_numbers = #tpu.dot_dimension_numbers<[1], [0], [0], [1], [0, 0, 1, 1], [], []>} : vector<16x32xf32>, vector<32x32xf32>, vector<16x32xf32> -> vector<16x32xf32>
    %c0_4 = arith.constant 0 : index
    %c0_5 = arith.constant 0 : index
    %6 = vector.load %arg3[%c0_4, %c0_5] : memref<1x32xf32, #tpu.memory_space<vmem>>, vector<1x32xf32>
    %7 = vector.broadcast %6 : vector<1x32xf32> to vector<16x32xf32>
    %8 = arith.addf %5, %7 : vector<16x32xf32>
    %cst_6 = arith.constant 0.000000e+00 : f32
    %9 = vector.broadcast %cst_6 : f32 to vector<16x32xf32>
    %10 = arith.maximumf %8, %9 : vector<16x32xf32>
    %c0_7 = arith.constant 0 : index
    %c0_8 = arith.constant 0 : index
    %11 = vector.load %arg6[%c0_7, %c0_8] : memref<2x32xf32, #tpu.memory_space<vmem>>, vector<1x32xf32>
    %cst_9 = arith.constant dense<0.000000e+00> : vector<32xf32>
    %12 = vector.multi_reduction <add>, %10, %cst_9 [0] : vector<16x32xf32> to vector<32xf32>
    %13 = vector.shape_cast %12 : vector<32xf32> to vector<1x32xf32>
    %14 = arith.addf %11, %13 : vector<1x32xf32>
    %c0_10 = arith.constant 0 : index
    %c0_11 = arith.constant 0 : index
    %15 = vector.load %arg6[%c0_10, %c0_11] : memref<2x32xf32, #tpu.memory_space<vmem>>, vector<1x32xf32>
    tpu.vector_store %arg6[%c0_10, %c0_11], %14 {strides = array<i32>} : memref<2x32xf32, #tpu.memory_space<vmem>>, vector<1x32xf32>,
    %c1 = arith.constant 1 : index
    %c0_12 = arith.constant 0 : index
    %16 = vector.load %arg6[%c1, %c0_12] : memref<2x32xf32, #tpu.memory_space<vmem>>, vector<1x32xf32>
    %17 = arith.mulf %10, %10 : vector<16x32xf32>
    %cst_13 = arith.constant dense<0.000000e+00> : vector<32xf32>
    %18 = vector.multi_reduction <add>, %17, %cst_13 [0] : vector<16x32xf32> to vector<32xf32>
    %19 = vector.shape_cast %18 : vector<32xf32> to vector<1x32xf32>
    %20 = arith.addf %16, %19 : vector<1x32xf32>
    %c1_14 = arith.constant 1 : index
    %c0_15 = arith.constant 0 : index
    %21 = vector.load %arg6[%c1_14, %c0_15] : memref<2x32xf32, #tpu.memory_space<vmem>>, vector<1x32xf32>
    tpu.vector_store %arg6[%c1_14, %c0_15], %20 {strides = array<i32>} : memref<2x32xf32, #tpu.memory_space<vmem>>, vector<1x32xf32>,
    %c0_i32_16 = arith.constant 0 : i32
    %22 = arith.cmpi eq, %arg0, %c0_i32_16 : i32
    %23 = arith.extui %22 : i1 to i32
    %c0_i32_17 = arith.constant 0 : i32
    %24 = arith.cmpi ne, %23, %c0_i32_17 : i32
    scf.if %24 {
      %c0_18 = arith.constant 0 : index
      %c0_19 = arith.constant 0 : index
      %25 = vector.load %arg6[%c0_18, %c0_19] : memref<2x32xf32, #tpu.memory_space<vmem>>, vector<1x32xf32>
      %cst_20 = arith.constant 6.250000e-02 : f32
      %26 = vector.broadcast %cst_20 : f32 to vector<1x32xf32>
      %27 = arith.mulf %25, %26 : vector<1x32xf32>
      %c1_21 = arith.constant 1 : index
      %c0_22 = arith.constant 0 : index
      %28 = vector.load %arg6[%c1_21, %c0_22] : memref<2x32xf32, #tpu.memory_space<vmem>>, vector<1x32xf32>
      %cst_23 = arith.constant 6.250000e-02 : f32
      %29 = vector.broadcast %cst_23 : f32 to vector<1x32xf32>
      %30 = arith.mulf %28, %29 : vector<1x32xf32>
      %31 = arith.mulf %27, %27 : vector<1x32xf32>
      %32 = arith.subf %30, %31 : vector<1x32xf32>
      %cst_24 = arith.constant 0.000000e+00 : f32
      %33 = vector.broadcast %cst_24 : f32 to vector<1x32xf32>
      %34 = arith.maximumf %32, %33 : vector<1x32xf32>
      %cst_25 = arith.constant 9.99999974E-6 : f32
      %35 = vector.broadcast %cst_25 : f32 to vector<1x32xf32>
      %36 = arith.addf %34, %35 : vector<1x32xf32>
      %37 = math.rsqrt %36 : vector<1x32xf32>
      %c0_26 = arith.constant 0 : index
      %c0_27 = arith.constant 0 : index
      %38 = vector.load %arg4[%c0_26, %c0_27] : memref<1x32xf32, #tpu.memory_space<vmem>>, vector<1x32xf32>
      %39 = arith.mulf %37, %38 : vector<1x32xf32>
      %c0_28 = arith.constant 0 : index
      %c0_29 = arith.constant 0 : index
      %40 = vector.load %arg5[%c0_28, %c0_29] : memref<1x32xf32, #tpu.memory_space<vmem>>, vector<1x32xf32>
      %41 = arith.mulf %27, %39 : vector<1x32xf32>
      %42 = arith.subf %40, %41 : vector<1x32xf32>
      %c0_30 = arith.constant 0 : index
      %c0_31 = arith.constant 0 : index
      %43 = vector.load %arg6[%c0_30, %c0_31] : memref<2x32xf32, #tpu.memory_space<vmem>>, vector<1x32xf32>
      tpu.vector_store %arg6[%c0_30, %c0_31], %39 {strides = array<i32>} : memref<2x32xf32, #tpu.memory_space<vmem>>, vector<1x32xf32>,
      %c1_32 = arith.constant 1 : index
      %c0_33 = arith.constant 0 : index
      %44 = vector.load %arg6[%c1_32, %c0_33] : memref<2x32xf32, #tpu.memory_space<vmem>>, vector<1x32xf32>
      tpu.vector_store %arg6[%c1_32, %c0_33], %42 {strides = array<i32>} : memref<2x32xf32, #tpu.memory_space<vmem>>, vector<1x32xf32>,
    } else {
    }
    return
  }
  func.func @transform_0(%arg0: i32) -> (i32, i32) {
    %c0_i32 = arith.constant 0 : i32
    %c0_i32_0 = arith.constant 0 : i32
    return %arg0, %c0_i32 : i32, i32
  }
  func.func @transform_1(%arg0: i32) -> (i32, i32) {
    %c0_i32 = arith.constant 0 : i32
    %c0_i32_0 = arith.constant 0 : i32
    %c0_i32_1 = arith.constant 0 : i32
    return %c0_i32, %c0_i32_0 : i32, i32
  }
  func.func @transform_2(%arg0: i32) -> (i32, i32) {
    %c0_i32 = arith.constant 0 : i32
    %c0_i32_0 = arith.constant 0 : i32
    %c0_i32_1 = arith.constant 0 : i32
    return %c0_i32, %c0_i32_0 : i32, i32
  }
  func.func @transform_3(%arg0: i32) -> (i32, i32) {
    %c0_i32 = arith.constant 0 : i32
    %c0_i32_0 = arith.constant 0 : i32
    %c0_i32_1 = arith.constant 0 : i32
    return %c0_i32, %c0_i32_0 : i32, i32
  }
  func.func @transform_4(%arg0: i32) -> (i32, i32) {
    %c0_i32 = arith.constant 0 : i32
    %c0_i32_0 = arith.constant 0 : i32
    %c0_i32_1 = arith.constant 0 : i32
    return %c0_i32, %c0_i32_0 : i32, i32
  }
  func.func @transform_5(%arg0: i32) -> (i32, i32) {
    %c0_i32 = arith.constant 0 : i32
    %c0_i32_0 = arith.constant 0 : i32
    %c0_i32_1 = arith.constant 0 : i32
    return %c0_i32, %c0_i32_0 : i32, i32
  }
}

module attributes {stable_mosaic.version = 11 : i64} {
  func.func @_stats_kernel(%arg0: i32, %arg1: memref<16x32xf32, #tpu.memory_space<vmem>>, %arg2: memref<32x32xf32, #tpu.memory_space<vmem>>, %arg3: memref<1x32xf32, #tpu.memory_space<vmem>>, %arg4: memref<1x32xf32, #tpu.memory_space<vmem>>, %arg5: memref<1x32xf32, #tpu.memory_space<vmem>>, %arg6: memref<2x32xf32, #tpu.memory_space<vmem>>) attributes {dimension_semantics = [#tpu.dimension_semantics<arbitrary>], iteration_bounds = array<i64: 1>, scalar_prefetch = 0 : i64, scratch_operands = 0 : i64, tpu.core_type = #tpu.core_type<tc>, window_params = [{transform_indices = @transform_0, window_bounds = array<i64: 16, 32>}, {pipeline_mode = #tpu.pipeline_mode<synchronous>, transform_indices = @transform_1, window_bounds = array<i64: 32, 32>}, {pipeline_mode = #tpu.pipeline_mode<synchronous>, transform_indices = @transform_2, window_bounds = array<i64: 1, 32>}, {pipeline_mode = #tpu.pipeline_mode<synchronous>, transform_indices = @transform_3, window_bounds = array<i64: 1, 32>}, {pipeline_mode = #tpu.pipeline_mode<synchronous>, transform_indices = @transform_4, window_bounds = array<i64: 1, 32>}, {pipeline_mode = #tpu.pipeline_mode<synchronous>, transform_indices = @transform_5, window_bounds = array<i64: 2, 32>}]} {
    %c0_i32 = arith.constant 0 : i32
    %0 = arith.cmpi eq, %arg0, %c0_i32 : i32
    %1 = arith.extui %0 : i1 to i32
    %c0_i32_0 = arith.constant 0 : i32
    %2 = arith.cmpi ne, %1, %c0_i32_0 : i32
    scf.if %2 {
      %cst_18 = arith.constant 0.000000e+00 : f32
      %25 = vector.broadcast %cst_18 : f32 to vector<2x32xf32>
      %c0_19 = arith.constant 0 : index
      %c0_20 = arith.constant 0 : index
      %26 = vector.load %arg6[%c0_19, %c0_20] : memref<2x32xf32, #tpu.memory_space<vmem>>, vector<2x32xf32>
      tpu.vector_store %arg6[%c0_19, %c0_20], %25 {strides = array<i32>} : memref<2x32xf32, #tpu.memory_space<vmem>>, vector<2x32xf32>,
    } else {
    }
    %c0 = arith.constant 0 : index
    %c0_1 = arith.constant 0 : index
    %3 = vector.load %arg1[%c0, %c0_1] : memref<16x32xf32, #tpu.memory_space<vmem>>, vector<16x32xf32>
    %c0_2 = arith.constant 0 : index
    %c0_3 = arith.constant 0 : index
    %4 = vector.load %arg2[%c0_2, %c0_3] : memref<32x32xf32, #tpu.memory_space<vmem>>, vector<32x32xf32>
    %cst = arith.constant dense<0.000000e+00> : vector<16x32xf32>
    %5 = tpu.matmul %3, %4, %cst {dimension_numbers = #tpu.dot_dimension_numbers<[1], [0], [0], [1], [0, 0, 1, 1], [], []>} : vector<16x32xf32>, vector<32x32xf32>, vector<16x32xf32> -> vector<16x32xf32>
    %c0_4 = arith.constant 0 : index
    %c0_5 = arith.constant 0 : index
    %6 = vector.load %arg3[%c0_4, %c0_5] : memref<1x32xf32, #tpu.memory_space<vmem>>, vector<1x32xf32>
    %7 = vector.broadcast %6 : vector<1x32xf32> to vector<16x32xf32>
    %8 = arith.addf %5, %7 : vector<16x32xf32>
    %cst_6 = arith.constant 0.000000e+00 : f32
    %9 = vector.broadcast %cst_6 : f32 to vector<16x32xf32>
    %10 = arith.maximumf %8, %9 : vector<16x32xf32>
    %c0_7 = arith.constant 0 : index
    %c0_8 = arith.constant 0 : index
    %11 = vector.load %arg6[%c0_7, %c0_8] : memref<2x32xf32, #tpu.memory_space<vmem>>, vector<1x32xf32>
    %cst_9 = arith.constant dense<0.000000e+00> : vector<32xf32>
    %12 = vector.multi_reduction <add>, %10, %cst_9 [0] : vector<16x32xf32> to vector<32xf32>
    %13 = vector.shape_cast %12 : vector<32xf32> to vector<1x32xf32>
    %14 = arith.addf %11, %13 : vector<1x32xf32>
    %c0_10 = arith.constant 0 : index
    %c0_11 = arith.constant 0 : index
    %15 = vector.load %arg6[%c0_10, %c0_11] : memref<2x32xf32, #tpu.memory_space<vmem>>, vector<1x32xf32>
    tpu.vector_store %arg6[%c0_10, %c0_11], %14 {strides = array<i32>} : memref<2x32xf32, #tpu.memory_space<vmem>>, vector<1x32xf32>,
    %c1 = arith.constant 1 : index
    %c0_12 = arith.constant 0 : index
    %16 = vector.load %arg6[%c1, %c0_12] : memref<2x32xf32, #tpu.memory_space<vmem>>, vector<1x32xf32>
    %17 = arith.mulf %10, %10 : vector<16x32xf32>
    %cst_13 = arith.constant dense<0.000000e+00> : vector<32xf32>
    %18 = vector.multi_reduction <add>, %17, %cst_13 [0] : vector<16x32xf32> to vector<32xf32>
    %19 = vector.shape_cast %18 : vector<32xf32> to vector<1x32xf32>
    %20 = arith.addf %16, %19 : vector<1x32xf32>
    %c1_14 = arith.constant 1 : index
    %c0_15 = arith.constant 0 : index
    %21 = vector.load %arg6[%c1_14, %c0_15] : memref<2x32xf32, #tpu.memory_space<vmem>>, vector<1x32xf32>
    tpu.vector_store %arg6[%c1_14, %c0_15], %20 {strides = array<i32>} : memref<2x32xf32, #tpu.memory_space<vmem>>, vector<1x32xf32>,
    %c0_i32_16 = arith.constant 0 : i32
    %22 = arith.cmpi eq, %arg0, %c0_i32_16 : i32
    %23 = arith.extui %22 : i1 to i32
    %c0_i32_17 = arith.constant 0 : i32
    %24 = arith.cmpi ne, %23, %c0_i32_17 : i32
    scf.if %24 {
      %c0_18 = arith.constant 0 : index
      %c0_19 = arith.constant 0 : index
      %25 = vector.load %arg6[%c0_18, %c0_19] : memref<2x32xf32, #tpu.memory_space<vmem>>, vector<1x32xf32>
      %cst_20 = arith.constant 6.250000e-02 : f32
      %26 = vector.broadcast %cst_20 : f32 to vector<1x32xf32>
      %27 = arith.mulf %25, %26 : vector<1x32xf32>
      %c1_21 = arith.constant 1 : index
      %c0_22 = arith.constant 0 : index
      %28 = vector.load %arg6[%c1_21, %c0_22] : memref<2x32xf32, #tpu.memory_space<vmem>>, vector<1x32xf32>
      %cst_23 = arith.constant 6.250000e-02 : f32
      %29 = vector.broadcast %cst_23 : f32 to vector<1x32xf32>
      %30 = arith.mulf %28, %29 : vector<1x32xf32>
      %31 = arith.mulf %27, %27 : vector<1x32xf32>
      %32 = arith.subf %30, %31 : vector<1x32xf32>
      %cst_24 = arith.constant 0.000000e+00 : f32
      %33 = vector.broadcast %cst_24 : f32 to vector<1x32xf32>
      %34 = arith.maximumf %32, %33 : vector<1x32xf32>
      %cst_25 = arith.constant 9.99999974E-6 : f32
      %35 = vector.broadcast %cst_25 : f32 to vector<1x32xf32>
      %36 = arith.addf %34, %35 : vector<1x32xf32>
      %37 = math.rsqrt %36 : vector<1x32xf32>
      %c0_26 = arith.constant 0 : index
      %c0_27 = arith.constant 0 : index
      %38 = vector.load %arg4[%c0_26, %c0_27] : memref<1x32xf32, #tpu.memory_space<vmem>>, vector<1x32xf32>
      %39 = arith.mulf %37, %38 : vector<1x32xf32>
      %c0_28 = arith.constant 0 : index
      %c0_29 = arith.constant 0 : index
      %40 = vector.load %arg5[%c0_28, %c0_29] : memref<1x32xf32, #tpu.memory_space<vmem>>, vector<1x32xf32>
      %41 = arith.mulf %27, %39 : vector<1x32xf32>
      %42 = arith.subf %40, %41 : vector<1x32xf32>
      %c0_30 = arith.constant 0 : index
      %c0_31 = arith.constant 0 : index
      %43 = vector.load %arg6[%c0_30, %c0_31] : memref<2x32xf32, #tpu.memory_space<vmem>>, vector<1x32xf32>
      tpu.vector_store %arg6[%c0_30, %c0_31], %39 {strides = array<i32>} : memref<2x32xf32, #tpu.memory_space<vmem>>, vector<1x32xf32>,
      %c1_32 = arith.constant 1 : index
      %c0_33 = arith.constant 0 : index
      %44 = vector.load %arg6[%c1_32, %c0_33] : memref<2x32xf32, #tpu.memory_space<vmem>>, vector<1x32xf32>
      tpu.vector_store %arg6[%c1_32, %c0_33], %42 {strides = array<i32>} : memref<2x32xf32, #tpu.memory_space<vmem>>, vector<1x32xf32>,
    } else {
    }
    return
  }
  func.func @transform_0(%arg0: i32) -> (i32, i32) {
    %c0_i32 = arith.constant 0 : i32
    %c0_i32_0 = arith.constant 0 : i32
    return %arg0, %c0_i32 : i32, i32
  }
  func.func @transform_1(%arg0: i32) -> (i32, i32) {
    %c0_i32 = arith.constant 0 : i32
    %c0_i32_0 = arith.constant 0 : i32
    %c0_i32_1 = arith.constant 0 : i32
    return %c0_i32, %c0_i32_0 : i32, i32
  }
  func.func @transform_2(%arg0: i32) -> (i32, i32) {
    %c0_i32 = arith.constant 0 : i32
    %c0_i32_0 = arith.constant 0 : i32
    %c0_i32_1 = arith.constant 0 : i32
    return %c0_i32, %c0_i32_0 : i32, i32
  }
  func.func @transform_3(%arg0: i32) -> (i32, i32) {
    %c0_i32 = arith.constant 0 : i32
    %c0_i32_0 = arith.constant 0 : i32
    %c0_i32_1 = arith.constant 0 : i32
    return %c0_i32, %c0_i32_0 : i32, i32
  }
  func.func @transform_4(%arg0: i32) -> (i32, i32) {
    %c0_i32 = arith.constant 0 : i32
    %c0_i32_0 = arith.constant 0 : i32
    %c0_i32_1 = arith.constant 0 : i32
    return %c0_i32, %c0_i32_0 : i32, i32
  }
  func.func @transform_5(%arg0: i32) -> (i32, i32) {
    %c0_i32 = arith.constant 0 : i32
    %c0_i32_0 = arith.constant 0 : i32
    %c0_i32_1 = arith.constant 0 : i32
    return %c0_i32, %c0_i32_0 : i32, i32
  }
}

</mosaic_0001>

<bundles_post_ra>
// kernel: tpu_custom_call.1
= control target key start
LH: loop header
LB: loop body
LE: loop exit
PB: predicated region body
PF: predicated region fallthrough
CT: control target
= control target key end

     0   :  { %10 = vsyncpa [#allocation3], 0  ;;  %s372_s0 = inlined_call_operand.hbm [shape: f32[16,32], index: 0, kind: input, shape index: {}]   ;;  %s373_s1 = inlined_call_operand.hbm [shape: f32[32,32], index: 1, kind: input, shape index: {}]   ;;  %s374_s2 = inlined_call_operand.vmem [shape: f32[1,32], index: 2, kind: input, shape index: {}]   ;;  %s375_s3 = inlined_call_operand.vmem [shape: f32[1,32], index: 3, kind: input, shape index: {}]   ;;  %s376_s4 = inlined_call_operand.vmem [shape: f32[1,32], index: 4, kind: input, shape index: {}]   ;;  %s377_s5 = inlined_call_operand.hbm [shape: f32[2,32], index: 5, kind: output, shape index: {}]  }
   0x1   :  { %11 = vsyncpa [#allocation6], 0 }
   0x2   :  { %12 = vsyncpa [#allocation4], 0  ;;  %s308_s18 = smov [#allocation2]  }
   0x3   :  { %s18_s19 = sshll.u32 %s308_s18, 4  ;;  %s19_s19 = int_to_ptr.vmem [resolvable:$true] %s18_s19 }
   0x4   :  { %s250_s20 = scalar_lea.vmem %s19_s19, 256  ;;  %p255_p1 = scmp.lt.s32.totalorder %s19_s19, %s19_s19 }
   0x5   :  { %p251_p0 = scmp.ne.s32.totalorder %s19_s19, %s250_s20  ;;  %p256_p2 = scmp.lt.s32.totalorder %s250_s20, %s250_s20 }
   0x7   :  { %p257_p3 = por %p256_p2, %p255_p1 }
   0x9   :  { %p258_p4 = pnand %p257_p3, %p251_p0 }
   0xb   :  { %261 = shalt.err (!%p258_p4)
}
   0xc   :  { %s309_s21 = smov 128   ;;  %s310_s22 = smov 8  }
   0xd   :  { %24 = dma.hbm_to_vmem [thread:$0]  %s372_s0, 256, %s19_s19, [#allocation3], %s309_s21, %s309_s21, %s310_s22  }
   0xe   :  { %s311_s25 = smov [#allocation5]  }
   0xf   :  { %s30_s26 = sshll.u32 %s311_s25, 4  ;;  %s31_s26 = int_to_ptr.vmem [resolvable:$true] %s30_s26 }
  0x10   :  { %s270_s27 = scalar_lea.vmem %s31_s26, 512  ;;  %p275_p6 = scmp.lt.s32.totalorder %s31_s26, %s31_s26 }
  0x11   :  { %p271_p5 = scmp.ne.s32.totalorder %s31_s26, %s270_s27  ;;  %p276_p7 = scmp.lt.s32.totalorder %s270_s27, %s270_s27 }
  0x13   :  { %p277_p8 = por %p276_p7, %p275_p6 }
  0x15   :  { %p278_p9 = pnand %p277_p8, %p271_p5 }
  0x17   :  { %281 = shalt.err (!%p278_p9)
}
  0x18   :  { %36 = dma.hbm_to_vmem [thread:$0]  %s373_s1, 512, %s31_s26, [#allocation6], %s309_s21, %s309_s21, %s310_s22  }
  0x19   :  { %302 = dma.done.wait [#allocation3], 256  }
  0x1a   :  { %303 = vsyncadd [#allocation3], 4294967040 }
  0x1b   :  { %304 = dma.done.wait [#allocation6], 512  }
  0x1c   :  { %305 = vsyncadd [#allocation6], 4294966784  ;;  %vm68_vm0 = vcmask 261120   ;;  %v60_v0 = vld [vmem:[#allocation5 + $0x18] sm:$0xff]  ;;  %v59_v1 = vld [vmem:[#allocation5 + $0x10] sm:$0xff]  ;;  %vm53_vm1 = vcmask 254976  }
  0x1d   :  { %223 = vmatprep.subr.mxu0 %v60_v0  ;;  %v55_v2 = vld [vmem:[#allocation2] sm:$0xff]  ;;  %v58_v3 = vld [vmem:[#allocation5 + $0x8] sm:$0xff]  ;;  %v57_v4 = vld [vmem:[#allocation5] sm:$0xff]  ;;  %v312_v6 = vmov 0.0   ;;  %vm163_vm2 = vcmask 253952   ;;  %s313_s8 = smov [#allocation7]  }
  0x1e   :  { %224 = vmatpush3.msra.mxu0 %v60_v0  ;;  %231 = vmatprep.mubr.msk.f32.mxu0 %vm68_vm0, %v55_v2  ;;  %v56_v5 = vld [vmem:[#allocation2 + $0x8] sm:$0xff]  ;;  %54 = vst.msk [vmem:[#allocation7] sm:$0x3] %vm53_vm1, %v312_v6  ;;  %v214_v7 = vld [vmem:[%s374_s2] ss:$0 sm:$0xff]  ;;  %s204_s9 = sshll.u32 %s313_s8, 4  ;;  %s205_s9 = int_to_ptr.vmem [resolvable:$true] %s204_s9 }
  0x1f   :  { %225 = vmatprep.subr.mxu0 %v59_v1  ;;  %v191_v46 = vld [vmem:[%s375_s3] sm:$0x1]  ;;  %s282_s10 = scalar_lea.vmem %s205_s9, 32  ;;  %p287_p11 = scmp.lt.s32.totalorder %s205_s9, %s205_s9 }
  0x20   :  { %226 = vmatpush3.msra.mxu0 %v59_v1  ;;  %v193_v49 = vld [vmem:[%s376_s4] sm:$0x1]  ;;  %p283_p10 = scmp.ne.s32.totalorder %s205_s9, %s282_s10  ;;  %p288_p12 = scmp.lt.s32.totalorder %s282_s10, %s282_s10 }
  0x21   :  { %227 = vmatprep.subr.mxu0 %v58_v3 }
  0x22   :  { %228 = vmatpush3.msra.mxu0 %v58_v3  ;;  %p289_p13 = por %p288_p12, %p287_p11 }
  0x23   :  { %229 = vmatprep.subr.mxu0 %v57_v4 }
  0x24   :  { %230 = vmatpush3.msra.mxu0 %v57_v4  ;;  %p290_p0 = pnand %p289_p13, %p283_p10 }
  0x25   :  { %232 = vmatmul.mubr.msk.f32.vlgmr.msra.gmra.mxu0 %vm68_vm0, %v56_v5  ;;  %v152_v31 = vld [vmem:[#allocation7] sm:$0x1]  ;;  %v165_v34 = vld [vmem:[#allocation7 + $0x1] sm:$0x1] }
  0xe5   :  { %v233_v8 = vpop.f32.mrf.mxu0 }
  0xe6   :  { %v147_v9 = vadd.f32 %v233_v8, %v214_v7 }
  0xe7   :  { %v141_v10 = vpop.f32.mrf.mxu0 }
  0xe8   :  { %v151_v11 = vmax.f32 %v147_v9, 0.0  ;;  %v142_v12 = vadd.f32 %v214_v7, %v141_v10 }
  0xea   :  { %v167_v13 = vmul.f32 %v151_v11, %v151_v11  ;;  %v150_v14 = vmax.f32 %v142_v12, 0.0  ;;  %v154_v15 = vsel %vm68_vm0, %v151_v11, 0.0 }
  0xec   :  { %v153_v16 = vsel %vm68_vm0, %v150_v14, 0.0  ;;  %v166_v17 = vmul.f32 %v150_v14, %v150_v14  ;;  %v169_v19 = vsel %vm68_vm0, %v167_v13, 0.0 }
  0xed   :  { %v155_v18 = vadd.f32 %v154_v15, %v153_v16 }
  0xee   :  { %v168_v20 = vsel %vm68_vm0, %v166_v17, 0.0 }
  0xef   :  { %v156_v21 = vrot.slane %v155_v18, 4  ;;  %v170_v22 = vadd.f32 %v169_v19, %v168_v20 }
  0xf1   :  { %v157_v23 = vadd.f32 %v156_v21, %v155_v18  ;;  %v171_v24 = vrot.slane %v170_v22, 4 }
  0xf3   :  { %v158_v25 = vrot.slane %v157_v23, 2  ;;  %v172_v26 = vadd.f32 %v171_v24, %v170_v22 }
  0xf5   :  { %v159_v27 = vadd.f32 %v158_v25, %v157_v23  ;;  %v173_v28 = vrot.slane %v172_v26, 2 }
  0xf7   :  { %v160_v29 = vrot.slane %v159_v27, 1  ;;  %v174_v30 = vadd.f32 %v173_v28, %v172_v26 }
  0xf9   :  { %v161_v32 = vadd.f32 %v160_v29, %v159_v27  ;;  %v175_v33 = vrot.slane %v174_v30, 1 }
  0xfb   :  { %v162_v35 = vadd.f32 %v161_v32, %v152_v31  ;;  %v176_v36 = vadd.f32 %v175_v33, %v174_v30 }
  0xfd   :  { %164 = vst.msk [vmem:[#allocation7] sm:$0x1] %vm163_vm2, %v162_v35  ;;  %v177_v37 = vadd.f32 %v176_v36, %v165_v34 }
  0xff   :  { %178 = vst.msk [vmem:[#allocation7 + $0x1] sm:$0x1] %vm163_vm2, %v177_v37 }
 0x104   :  { %v182_v38 = vld [vmem:[#allocation7] sm:$0x1] }
 0x105   :  { %v183_v39 = vmul.f32 0.0625, %v182_v38 }
 0x106   :  { %v184_v40 = vld [vmem:[#allocation7 + $0x1] sm:$0x1] }
 0x107   :  { %v185_v41 = vmul.f32 0.0625, %v184_v40  ;;  %v186_v42 = vmul.f32 %v183_v39, %v183_v39 }
 0x109   :  { %v187_v43 = vsub.f32 %v185_v41, %v186_v42 }
 0x10b   :  { %v188_v44 = vmax.f32 %v187_v43, 0.0 }
 0x10d   :  { %v189_v45 = vadd.f32 1e-05, %v188_v44 }
 0x10f   :  { %240 = vrsqrt.f32 %v189_v45 }
 0x11c   :  { %v241_v47 = vpop.eup %240 }
 0x11d   :  { %v192_v48 = vmul.f32 %v241_v47, %v191_v46 }
 0x11f   :  { %v194_v50 = vmul.f32 %v192_v48, %v183_v39  ;;  %196 = vst.msk [vmem:[#allocation7] sm:$0x1] %vm163_vm2, %v192_v48 }
 0x121   :  { %v195_v51 = vsub.f32 %v193_v49, %v194_v50 }
 0x123   :  { %197 = vst.msk [vmem:[#allocation7 + $0x1] sm:$0x1] %vm163_vm2, %v195_v51 }
 0x124   :  { %293 = shalt.err (!%p290_p0)
}
 0x125   :  { %207 = dma.vmem_to_hbm [thread:$0]  %s205_s9, 32, %s377_s5, [#allocation4]  }
 0x126   :  { %306 = dma.done.wait [#allocation4], 32  }
 0x127   :  { %307 = vsyncadd [#allocation4], 4294967264 }
 0x128   :  { %211 = vsyncpa [#allocation3], 1 }
 0x129   :  { %212 = vsyncpa [#allocation6], 1 }
 0x12a   :  { %213 = vsyncpa [#allocation4], 1 }

// kernel: tpu_custom_call.1
= control target key start
LH: loop header
LB: loop body
LE: loop exit
PB: predicated region body
PF: predicated region fallthrough
CT: control target
= control target key end

     0   :  { %10 = vsyncpa [#allocation3], 0  ;;  %s372_s0 = inlined_call_operand.hbm [shape: f32[16,32], index: 0, kind: input, shape index: {}]   ;;  %s373_s1 = inlined_call_operand.hbm [shape: f32[32,32], index: 1, kind: input, shape index: {}]   ;;  %s374_s2 = inlined_call_operand.vmem [shape: f32[1,32], index: 2, kind: input, shape index: {}]   ;;  %s375_s3 = inlined_call_operand.vmem [shape: f32[1,32], index: 3, kind: input, shape index: {}]   ;;  %s376_s4 = inlined_call_operand.vmem [shape: f32[1,32], index: 4, kind: input, shape index: {}]   ;;  %s377_s5 = inlined_call_operand.hbm [shape: f32[2,32], index: 5, kind: output, shape index: {}]  }
   0x1   :  { %11 = vsyncpa [#allocation6], 0 }
   0x2   :  { %12 = vsyncpa [#allocation4], 0  ;;  %s308_s18 = smov [#allocation2]  }
   0x3   :  { %s18_s19 = sshll.u32 %s308_s18, 4  ;;  %s19_s19 = int_to_ptr.vmem [resolvable:$true] %s18_s19 }
   0x4   :  { %s250_s20 = scalar_lea.vmem %s19_s19, 256  ;;  %p255_p1 = scmp.lt.s32.totalorder %s19_s19, %s19_s19 }
   0x5   :  { %p251_p0 = scmp.ne.s32.totalorder %s19_s19, %s250_s20  ;;  %p256_p2 = scmp.lt.s32.totalorder %s250_s20, %s250_s20 }
   0x7   :  { %p257_p3 = por %p256_p2, %p255_p1 }
   0x9   :  { %p258_p4 = pnand %p257_p3, %p251_p0 }
   0xb   :  { %261 = shalt.err (!%p258_p4)
}
   0xc   :  { %s309_s21 = smov 128   ;;  %s310_s22 = smov 8  }
   0xd   :  { %24 = dma.hbm_to_vmem [thread:$0]  %s372_s0, 256, %s19_s19, [#allocation3], %s309_s21, %s309_s21, %s310_s22  }
   0xe   :  { %s311_s25 = smov [#allocation5]  }
   0xf   :  { %s30_s26 = sshll.u32 %s311_s25, 4  ;;  %s31_s26 = int_to_ptr.vmem [resolvable:$true] %s30_s26 }
  0x10   :  { %s270_s27 = scalar_lea.vmem %s31_s26, 512  ;;  %p275_p6 = scmp.lt.s32.totalorder %s31_s26, %s31_s26 }
  0x11   :  { %p271_p5 = scmp.ne.s32.totalorder %s31_s26, %s270_s27  ;;  %p276_p7 = scmp.lt.s32.totalorder %s270_s27, %s270_s27 }
  0x13   :  { %p277_p8 = por %p276_p7, %p275_p6 }
  0x15   :  { %p278_p9 = pnand %p277_p8, %p271_p5 }
  0x17   :  { %281 = shalt.err (!%p278_p9)
}
  0x18   :  { %36 = dma.hbm_to_vmem [thread:$0]  %s373_s1, 512, %s31_s26, [#allocation6], %s309_s21, %s309_s21, %s310_s22  }
  0x19   :  { %302 = dma.done.wait [#allocation3], 256  }
  0x1a   :  { %303 = vsyncadd [#allocation3], 4294967040 }
  0x1b   :  { %304 = dma.done.wait [#allocation6], 512  }
  0x1c   :  { %305 = vsyncadd [#allocation6], 4294966784  ;;  %vm68_vm0 = vcmask 261120   ;;  %v60_v0 = vld [vmem:[#allocation5 + $0x18] sm:$0xff]  ;;  %v59_v1 = vld [vmem:[#allocation5 + $0x10] sm:$0xff]  ;;  %vm53_vm1 = vcmask 254976  }
  0x1d   :  { %223 = vmatprep.subr.mxu0 %v60_v0  ;;  %v55_v2 = vld [vmem:[#allocation2] sm:$0xff]  ;;  %v58_v3 = vld [vmem:[#allocation5 + $0x8] sm:$0xff]  ;;  %v57_v4 = vld [vmem:[#allocation5] sm:$0xff]  ;;  %v312_v6 = vmov 0.0   ;;  %vm163_vm2 = vcmask 253952   ;;  %s313_s8 = smov [#allocation7]  }
  0x1e   :  { %224 = vmatpush3.msra.mxu0 %v60_v0  ;;  %231 = vmatprep.mubr.msk.f32.mxu0 %vm68_vm0, %v55_v2  ;;  %v56_v5 = vld [vmem:[#allocation2 + $0x8] sm:$0xff]  ;;  %54 = vst.msk [vmem:[#allocation7] sm:$0x3] %vm53_vm1, %v312_v6  ;;  %v214_v7 = vld [vmem:[%s374_s2] ss:$0 sm:$0xff]  ;;  %s204_s9 = sshll.u32 %s313_s8, 4  ;;  %s205_s9 = int_to_ptr.vmem [resolvable:$true] %s204_s9 }
  0x1f   :  { %225 = vmatprep.subr.mxu0 %v59_v1  ;;  %v191_v46 = vld [vmem:[%s375_s3] sm:$0x1]  ;;  %s282_s10 = scalar_lea.vmem %s205_s9, 32  ;;  %p287_p11 = scmp.lt.s32.totalorder %s205_s9, %s205_s9 }
  0x20   :  { %226 = vmatpush3.msra.mxu0 %v59_v1  ;;  %v193_v49 = vld [vmem:[%s376_s4] sm:$0x1]  ;;  %p283_p10 = scmp.ne.s32.totalorder %s205_s9, %s282_s10  ;;  %p288_p12 = scmp.lt.s32.totalorder %s282_s10, %s282_s10 }
  0x21   :  { %227 = vmatprep.subr.mxu0 %v58_v3 }
  0x22   :  { %228 = vmatpush3.msra.mxu0 %v58_v3  ;;  %p289_p13 = por %p288_p12, %p287_p11 }
  0x23   :  { %229 = vmatprep.subr.mxu0 %v57_v4 }
  0x24   :  { %230 = vmatpush3.msra.mxu0 %v57_v4  ;;  %p290_p0 = pnand %p289_p13, %p283_p10 }
  0x25   :  { %232 = vmatmul.mubr.msk.f32.vlgmr.msra.gmra.mxu0 %vm68_vm0, %v56_v5  ;;  %v152_v31 = vld [vmem:[#allocation7] sm:$0x1]  ;;  %v165_v34 = vld [vmem:[#allocation7 + $0x1] sm:$0x1] }
  0xe5   :  { %v233_v8 = vpop.f32.mrf.mxu0 }
  0xe6   :  { %v147_v9 = vadd.f32 %v233_v8, %v214_v7 }
  0xe7   :  { %v141_v10 = vpop.f32.mrf.mxu0 }
  0xe8   :  { %v151_v11 = vmax.f32 %v147_v9, 0.0  ;;  %v142_v12 = vadd.f32 %v214_v7, %v141_v10 }
  0xea   :  { %v167_v13 = vmul.f32 %v151_v11, %v151_v11  ;;  %v150_v14 = vmax.f32 %v142_v12, 0.0  ;;  %v154_v15 = vsel %vm68_vm0, %v151_v11, 0.0 }
  0xec   :  { %v153_v16 = vsel %vm68_vm0, %v150_v14, 0.0  ;;  %v166_v17 = vmul.f32 %v150_v14, %v150_v14  ;;  %v169_v19 = vsel %vm68_vm0, %v167_v13, 0.0 }
  0xed   :  { %v155_v18 = vadd.f32 %v154_v15, %v153_v16 }
  0xee   :  { %v168_v20 = vsel %vm68_vm0, %v166_v17, 0.0 }
  0xef   :  { %v156_v21 = vrot.slane %v155_v18, 4  ;;  %v170_v22 = vadd.f32 %v169_v19, %v168_v20 }
  0xf1   :  { %v157_v23 = vadd.f32 %v156_v21, %v155_v18  ;;  %v171_v24 = vrot.slane %v170_v22, 4 }
  0xf3   :  { %v158_v25 = vrot.slane %v157_v23, 2  ;;  %v172_v26 = vadd.f32 %v171_v24, %v170_v22 }
  0xf5   :  { %v159_v27 = vadd.f32 %v158_v25, %v157_v23  ;;  %v173_v28 = vrot.slane %v172_v26, 2 }
  0xf7   :  { %v160_v29 = vrot.slane %v159_v27, 1  ;;  %v174_v30 = vadd.f32 %v173_v28, %v172_v26 }
  0xf9   :  { %v161_v32 = vadd.f32 %v160_v29, %v159_v27  ;;  %v175_v33 = vrot.slane %v174_v30, 1 }
  0xfb   :  { %v162_v35 = vadd.f32 %v161_v32, %v152_v31  ;;  %v176_v36 = vadd.f32 %v175_v33, %v174_v30 }
  0xfd   :  { %164 = vst.msk [vmem:[#allocation7] sm:$0x1] %vm163_vm2, %v162_v35  ;;  %v177_v37 = vadd.f32 %v176_v36, %v165_v34 }
  0xff   :  { %178 = vst.msk [vmem:[#allocation7 + $0x1] sm:$0x1] %vm163_vm2, %v177_v37 }
 0x104   :  { %v182_v38 = vld [vmem:[#allocation7] sm:$0x1] }
 0x105   :  { %v183_v39 = vmul.f32 0.0625, %v182_v38 }
 0x106   :  { %v184_v40 = vld [vmem:[#allocation7 + $0x1] sm:$0x1] }
 0x107   :  { %v185_v41 = vmul.f32 0.0625, %v184_v40  ;;  %v186_v42 = vmul.f32 %v183_v39, %v183_v39 }
 0x109   :  { %v187_v43 = vsub.f32 %v185_v41, %v186_v42 }
 0x10b   :  { %v188_v44 = vmax.f32 %v187_v43, 0.0 }
 0x10d   :  { %v189_v45 = vadd.f32 1e-05, %v188_v44 }
 0x10f   :  { %240 = vrsqrt.f32 %v189_v45 }
 0x11c   :  { %v241_v47 = vpop.eup %240 }
 0x11d   :  { %v192_v48 = vmul.f32 %v241_v47, %v191_v46 }
 0x11f   :  { %v194_v50 = vmul.f32 %v192_v48, %v183_v39  ;;  %196 = vst.msk [vmem:[#allocation7] sm:$0x1] %vm163_vm2, %v192_v48 }
 0x121   :  { %v195_v51 = vsub.f32 %v193_v49, %v194_v50 }
 0x123   :  { %197 = vst.msk [vmem:[#allocation7 + $0x1] sm:$0x1] %vm163_vm2, %v195_v51 }
 0x124   :  { %293 = shalt.err (!%p290_p0)
}
 0x125   :  { %207 = dma.vmem_to_hbm [thread:$0]  %s205_s9, 32, %s377_s5, [#allocation4]  }
 0x126   :  { %306 = dma.done.wait [#allocation4], 32  }
 0x127   :  { %307 = vsyncadd [#allocation4], 4294967264 }
 0x128   :  { %211 = vsyncpa [#allocation3], 1 }
 0x129   :  { %212 = vsyncpa [#allocation6], 1 }
 0x12a   :  { %213 = vsyncpa [#allocation4], 1 }

</bundles_post_ra>
